<compile_context>
chip_gen: v5e
topology: v5e:2x2
jax: 0.10.0
libtpu: 0.0.40
codegen_flags: <defaults>
</compile_context>

<pallas_src>
import functools
import math

import jax
import jax.numpy as jnp
from jax.experimental import pallas as pl
from jax.experimental.pallas import tpu as pltpu


def _round_up(a: int, b: int) -> int:
    return ((a + b - 1) // b) * b


def _vmem_limit(nbytes_needed: int) -> int:
    # Leave headroom, stay within the smallest physical VMEM (v7x: 64 MiB/TC).
    return int(min(64 * 1024 * 1024, max(32 * 1024 * 1024, 2 * nbytes_needed)))


# ---------------------------------------------------------------------------
# Fast path: full vocab in one block (weight resident in VMEM).
# ---------------------------------------------------------------------------
def _generator_full_vocab_kernel(x_ref, w_ref, b_ref, o_ref):
    # x_ref: (TM, D)  w_ref: (D, V)  b_ref: (1, V)  o_ref: (TM, V)
    logits = jnp.dot(x_ref[...], w_ref[...], preferred_element_type=jnp.float32)
    logits = logits + b_ref[...].astype(jnp.float32)
    m = jnp.max(logits, axis=-1, keepdims=True)
    shifted = logits - m
    lse = jnp.log(jnp.sum(jnp.exp(shifted), axis=-1, keepdims=True))
    o_ref[...] = (shifted - lse).astype(o_ref.dtype)


def _full_vocab_pallas(x2d, wc, b2d, *, tm, out_dtype, single_buffer_consts):
    rows_p, d_model = x2d.shape
    vocab = wc.shape[1]
    out_itemsize = jnp.dtype(out_dtype).itemsize
    c_itemsize = x2d.dtype.itemsize

    # W / b have constant index maps -> they never re-DMA; single-buffer them
    # so the resident weight is not allocated twice.
    const_kwargs = {"pipeline_mode": pl.Buffered(1)} if single_buffer_consts else {}

    needed = (
        (2 if not single_buffer_consts else 1) * d_model * vocab * c_itemsize  # weight
        + 2 * vocab * 4                                   # bias
        + 2 * tm * d_model * c_itemsize                   # x tiles (double buffered)
        + 2 * tm * vocab * out_itemsize                   # out tiles
        + (2 << 20)                                       # slack
    )
    cost = pl.CostEstimate(
        flops=2 * rows_p * d_model * vocab,
        transcendentals=rows_p * vocab + rows_p,
        bytes_accessed=(rows_p * d_model * c_itemsize
                        + d_model * vocab * c_itemsize
                        + vocab * 4
                        + rows_p * vocab * out_itemsize),
    )
    return pl.pallas_call(
        _generator_full_vocab_kernel,
        out_shape=jax.ShapeDtypeStruct((rows_p, vocab), out_dtype),
        grid_spec=pltpu.PrefetchScalarGridSpec(
            num_scalar_prefetch=0,
            grid=(rows_p // tm,),
            in_specs=[
                pl.BlockSpec((tm, d_model), lambda i: (i, 0)),
                pl.BlockSpec((d_model, vocab), lambda i: (0, 0), **const_kwargs),
                pl.BlockSpec((1, vocab), lambda i: (0, 0), **const_kwargs),
            ],
            out_specs=pl.BlockSpec((tm, vocab), lambda i: (i, 0)),
        ),
        compiler_params=pltpu.CompilerParams(
            dimension_semantics=("parallel",),
            vmem_limit_bytes=_vmem_limit(needed),
        ),
        cost_estimate=cost,
    )(x2d, wc, b2d)


_SINGLE_BUFFER_OK = True  # flipped off if pl.Buffered(1) is rejected by this JAX build


def _call_full_vocab(x2d, wc, b2d, *, tm, out_dtype):
    global _SINGLE_BUFFER_OK
    if _SINGLE_BUFFER_OK:
        try:
            return _full_vocab_pallas(
                x2d, wc, b2d, tm=tm, out_dtype=out_dtype, single_buffer_consts=True)
        except Exception:
            _SINGLE_BUFFER_OK = False
    return _full_vocab_pallas(
        x2d, wc, b2d, tm=tm, out_dtype=out_dtype, single_buffer_consts=False)


# ---------------------------------------------------------------------------
# Large-vocab path: vocab grid axis + online log-sum-exp (two passes).
# ---------------------------------------------------------------------------
def _generator_lse_kernel(x_ref, w_ref, b_ref, lse_ref, m_sc, l_sc):
    # Online (flash-style) log-sum-exp over vocab tiles (trailing grid axis).
    j = pl.program_id(1)

    @pl.when(j == 0)
    def _():
        m_sc[...] = jnp.full(m_sc.shape, -jnp.inf, dtype=jnp.float32)
        l_sc[...] = jnp.zeros(l_sc.shape, dtype=jnp.float32)

    logits = jnp.dot(x_ref[...], w_ref[...], preferred_element_type=jnp.float32)
    logits = logits + b_ref[...].astype(jnp.float32)
    m_prev = m_sc[...]
    m_new = jnp.maximum(m_prev, jnp.max(logits, axis=-1, keepdims=True))
    l_sc[...] = (jnp.exp(m_prev - m_new) * l_sc[...]
                 + jnp.sum(jnp.exp(logits - m_new), axis=-1, keepdims=True))
    m_sc[...] = m_new

    @pl.when(j == pl.num_programs(1) - 1)
    def _():
        lse_ref[...] = m_sc[...] + jnp.log(l_sc[...])


def _generator_emit_kernel(x_ref, w_ref, b_ref, lse_ref, o_ref):
    logits = jnp.dot(x_ref[...], w_ref[...], preferred_element_type=jnp.float32)
    logits = logits + b_ref[...].astype(jnp.float32)
    o_ref[...] = (logits - lse_ref[...]).astype(o_ref.dtype)


def _call_tiled_vocab(x2d, wc, b2d, *, tm, tv, out_dtype):
    rows_p, d_model = x2d.shape
    vocab = wc.shape[1]
    out_itemsize = jnp.dtype(out_dtype).itemsize
    c_itemsize = x2d.dtype.itemsize
    grid = (rows_p // tm, vocab // tv)

    needed = (2 * tm * d_model * c_itemsize + 2 * d_model * tv * c_itemsize
              + 2 * tv * 4 + 2 * tm * tv * out_itemsize + 2 * tm * 4 * 4
              + (2 << 20))
    vmem = _vmem_limit(needed)
    matmul_bytes = (rows_p * d_model * c_itemsize
                    + (rows_p // tm) * d_model * vocab * c_itemsize
                    + vocab * 4)

    # Pass 1: per-row log-sum-exp (vocab is a reduction axis -> "arbitrary").
    lse = pl.pallas_call(
        _generator_lse_kernel,
        out_shape=jax.ShapeDtypeStruct((rows_p, 1), jnp.float32),
        grid_spec=pltpu.PrefetchScalarGridSpec(
            num_scalar_prefetch=0,
            grid=grid,
            in_specs=[
                pl.BlockSpec((tm, d_model), lambda i, j: (i, 0)),
                pl.BlockSpec((d_model, tv), lambda i, j: (0, j)),
                pl.BlockSpec((1, tv), lambda i, j: (0, j)),
            ],
            out_specs=pl.BlockSpec((tm, 1), lambda i, j: (i, 0)),
            scratch_shapes=[pltpu.VMEM((tm, 1), jnp.float32),
                            pltpu.VMEM((tm, 1), jnp.float32)],
        ),
        compiler_params=pltpu.CompilerParams(
            dimension_semantics=("parallel", "arbitrary"),
            vmem_limit_bytes=vmem,
        ),
        cost_estimate=pl.CostEstimate(
            flops=2 * rows_p * d_model * vocab,
            transcendentals=rows_p * vocab + rows_p,
            bytes_accessed=matmul_bytes + rows_p * 4,
        ),
    )(x2d, wc, b2d)

    # Pass 2: emit log-probs tile by tile (fully parallel).
    out = pl.pallas_call(
        _generator_emit_kernel,
        out_shape=jax.ShapeDtypeStruct((rows_p, vocab), out_dtype),
        grid_spec=pltpu.PrefetchScalarGridSpec(
            num_scalar_prefetch=0,
            grid=grid,
            in_specs=[
                pl.BlockSpec((tm, d_model), lambda i, j: (i, 0)),
                pl.BlockSpec((d_model, tv), lambda i, j: (0, j)),
                pl.BlockSpec((1, tv), lambda i, j: (0, j)),
                pl.BlockSpec((tm, 1), lambda i, j: (i, 0)),
            ],
            out_specs=pl.BlockSpec((tm, tv), lambda i, j: (i, j)),
        ),
        compiler_params=pltpu.CompilerParams(
            dimension_semantics=("parallel", "parallel"),
            vmem_limit_bytes=vmem,
        ),
        cost_estimate=pl.CostEstimate(
            flops=2 * rows_p * d_model * vocab,
            transcendentals=0,
            bytes_accessed=matmul_bytes + rows_p * 4 + rows_p * vocab * out_itemsize,
        ),
    )(x2d, wc, b2d, lse)
    return out


# ---------------------------------------------------------------------------
# Public wrapper (matches Generator.forward semantics).
# ---------------------------------------------------------------------------
def generator_forward(x, w, b, *, tile_rows=256, vocab_block=None,
                      compute_dtype=jnp.bfloat16):
    """log_softmax(x @ w + b, axis=-1).

    x: [..., d_model]
    w: [d_model, vocab]   (transpose of PyTorch nn.Linear weight)
    b: [vocab]
    vocab_block: None -> keep full vocab resident (fast path for moderate vocab);
                 otherwise a multiple of 128 dividing vocab -> VMEM-bounded
                 two-pass online-log-softmax path for large vocabularies.
    """
    d_model, vocab = w.shape
    assert x.shape[-1] == d_model
    lead = x.shape[:-1]
    rows = math.prod(lead)
    out_dtype = x.dtype

    cdt = jnp.dtype(compute_dtype)
    sub = 16 if cdt.itemsize < 4 else 8        # sublane granularity (bf16 packs 2/row)
    tm = max(sub, min(int(tile_rows), _round_up(rows, sub)))
    tm = _round_up(tm, sub)
    rows_p = _round_up(rows, tm)               # pad rows instead of asserting

    x2d = x.reshape(rows, d_model).astype(cdt)
    if rows_p != rows:
        x2d = jnp.pad(x2d, ((0, rows_p - rows), (0, 0)))
    wc = w.astype(cdt)
    b2d = b.reshape(1, vocab).astype(jnp.float32)

    if vocab_block is None or int(vocab_block) >= vocab:
        out2d = _call_full_vocab(x2d, wc, b2d, tm=tm, out_dtype=out_dtype)
    else:
        tv = int(vocab_block)
        assert tv % 128 == 0 and vocab % tv == 0, (
            "vocab_block must be a multiple of 128 that divides vocab")
        out2d = _call_tiled_vocab(x2d, wc, b2d, tm=tm, tv=tv, out_dtype=out_dtype)

    if rows_p != rows:
        out2d = out2d[:rows]
    return out2d.reshape(*lead, vocab)


def init_generator_params(key, d_model, vocab):
    """Deterministic init mimicking nn.Linear: U(-1/sqrt(d_model), 1/sqrt(d_model))."""
    k_w, k_b = jax.random.split(key)
    bound = 1.0 / (d_model ** 0.5)
    # Stored already transposed: [d_model, vocab]
    w = jax.random.uniform(k_w, (d_model, vocab), jnp.float32, minval=-bound, maxval=bound)
    b = jax.random.uniform(k_b, (vocab,), jnp.float32, minval=-bound, maxval=bound)
    return w, b


if __name__ == "__main__":
    # Small shapes consistent with the module's forward: x [batch, seq, d_model]
    batch, seq, d_model, vocab = 2, 8, 32, 256

    key = jax.random.PRNGKey(0)
    k_x, k_p = jax.random.split(key)
    x = jax.random.normal(k_x, (batch, seq, d_model), jnp.float32)
    w, b = init_generator_params(k_p, d_model, vocab)

    # 1) Fast path (full-vocab block resident, bf16 compute).
    out1 = generator_forward(x, w, b)
    jax.block_until_ready(out1)
    # 2) Large-vocab path (vocab tiled, online log-sum-exp), forced small tile here.
    out2 = generator_forward(x, w, b, vocab_block=128)
    jax.block_until_ready(out2)
    # 3) f32 compute path for an exact cross-check against plain JAX.
    out3 = generator_forward(x, w, b, compute_dtype=jnp.float32)
    jax.block_until_ready(out3)

    assert out1.shape == (batch, seq, vocab)
    assert out2.shape == (batch, seq, vocab)

    # log-probs must exponentiate to a distribution
    assert bool(jnp.allclose(jnp.sum(jnp.exp(out1), axis=-1), 1.0, atol=1e-3))
    assert bool(jnp.allclose(jnp.sum(jnp.exp(out2), axis=-1), 1.0, atol=1e-3))

    # references
    ref_f32 = jax.nn.log_softmax(x @ w + b, axis=-1)
    xr = x.astype(jnp.bfloat16).astype(jnp.float32)
    wr = w.astype(jnp.bfloat16).astype(jnp.float32)
    ref_bf16 = jax.nn.log_softmax(xr @ wr + b, axis=-1)

    assert bool(jnp.allclose(out3, ref_f32, atol=1e-5))        # exact-dtype path
    assert bool(jnp.allclose(out1, ref_bf16, atol=2e-3))       # bf16-compute paths
    assert bool(jnp.allclose(out2, ref_bf16, atol=2e-3))
    assert bool(jnp.allclose(out1, out2, atol=2e-3))
    assert bool(jnp.allclose(out1, ref_f32, atol=5e-2))        # vs f32 module semantics

    print("KERNEL_OK")
</pallas_src>

<mosaic_0001>
module attributes {stable_mosaic.version = 11 : i64} {
  func.func @_generator_full_vocab_kernel(%arg0: i32, %arg1: memref<16x32xbf16, #tpu.memory_space<vmem>>, %arg2: memref<32x256xbf16, #tpu.memory_space<vmem>>, %arg3: memref<1x256xf32, #tpu.memory_space<vmem>>, %arg4: memref<16x256xf32, #tpu.memory_space<vmem>>) attributes {dimension_semantics = [#tpu.dimension_semantics<parallel>], iteration_bounds = array<i64: 1>, scalar_prefetch = 0 : i64, scratch_operands = 0 : i64, tpu.core_type = #tpu.core_type<tc>, window_params = [{transform_indices = @transform_0, window_bounds = array<i64: 16, 32>}, {pipeline_mode = #tpu.pipeline_mode<synchronous>, transform_indices = @transform_1, window_bounds = array<i64: 32, 256>}, {pipeline_mode = #tpu.pipeline_mode<synchronous>, transform_indices = @transform_2, window_bounds = array<i64: 1, 256>}, {transform_indices = @transform_3, window_bounds = array<i64: 16, 256>}]} {
    %c0 = arith.constant 0 : index
    %c0_0 = arith.constant 0 : index
    %0 = vector.load %arg1[%c0, %c0_0] : memref<16x32xbf16, #tpu.memory_space<vmem>>, vector<16x32xbf16>
    %c0_1 = arith.constant 0 : index
    %c0_2 = arith.constant 0 : index
    %1 = vector.load %arg2[%c0_1, %c0_2] : memref<32x256xbf16, #tpu.memory_space<vmem>>, vector<32x256xbf16>
    %cst = arith.constant dense<0.000000e+00> : vector<16x256xf32>
    %2 = tpu.matmul %0, %1, %cst {dimension_numbers = #tpu.dot_dimension_numbers<[1], [0], [0], [1], [0, 0, 1, 1], [], []>} : vector<16x32xbf16>, vector<32x256xbf16>, vector<16x256xf32> -> vector<16x256xf32>
    %c0_3 = arith.constant 0 : index
    %c0_4 = arith.constant 0 : index
    %3 = vector.load %arg3[%c0_3, %c0_4] : memref<1x256xf32, #tpu.memory_space<vmem>>, vector<1x256xf32>
    %4 = vector.broadcast %3 : vector<1x256xf32> to vector<16x256xf32>
    %5 = arith.addf %2, %4 : vector<16x256xf32>
    %cst_5 = arith.constant dense<0xFF800000> : vector<16xf32>
    %6 = vector.multi_reduction <maximumf>, %5, %cst_5 [1] : vector<16x256xf32> to vector<16xf32>
    %7 = vector.shape_cast %6 : vector<16xf32> to vector<16x1xf32>
    %8 = vector.broadcast %7 : vector<16x1xf32> to vector<16x256xf32>
    %9 = arith.subf %5, %8 : vector<16x256xf32>
    %10 = math.exp %9 : vector<16x256xf32>
    %cst_6 = arith.constant dense<0.000000e+00> : vector<16xf32>
    %11 = vector.multi_reduction <add>, %10, %cst_6 [1] : vector<16x256xf32> to vector<16xf32>
    %12 = vector.shape_cast %11 : vector<16xf32> to vector<16x1xf32>
    %13 = math.log %12 : vector<16x1xf32>
    %14 = vector.broadcast %13 : vector<16x1xf32> to vector<16x256xf32>
    %15 = arith.subf %9, %14 : vector<16x256xf32>
    %c0_7 = arith.constant 0 : index
    %c0_8 = arith.constant 0 : index
    %16 = vector.load %arg4[%c0_7, %c0_8] : memref<16x256xf32, #tpu.memory_space<vmem>>, vector<16x256xf32>
    tpu.vector_store %arg4[%c0_7, %c0_8], %15 {strides = array<i32>} : memref<16x256xf32, #tpu.memory_space<vmem>>, vector<16x256xf32>,
    return
  }
  func.func @transform_0(%arg0: i32) -> (i32, i32) {
    %c0_i32 = arith.constant 0 : i32
    %c0_i32_0 = arith.constant 0 : i32
    return %arg0, %c0_i32 : i32, i32
  }
  func.func @transform_1(%arg0: i32) -> (i32, i32) {
    %c0_i32 = arith.constant 0 : i32
    %c0_i32_0 = arith.constant 0 : i32
    %c0_i32_1 = arith.constant 0 : i32
    return %c0_i32, %c0_i32_0 : i32, i32
  }
  func.func @transform_2(%arg0: i32) -> (i32, i32) {
    %c0_i32 = arith.constant 0 : i32
    %c0_i32_0 = arith.constant 0 : i32
    %c0_i32_1 = arith.constant 0 : i32
    return %c0_i32, %c0_i32_0 : i32, i32
  }
  func.func @transform_3(%arg0: i32) -> (i32, i32) {
    %c0_i32 = arith.constant 0 : i32
    %c0_i32_0 = arith.constant 0 : i32
    return %arg0, %c0_i32 : i32, i32
  }
}

module attributes {stable_mosaic.version = 11 : i64} {
  func.func @_generator_full_vocab_kernel(%arg0: i32, %arg1: memref<16x32xbf16, #tpu.memory_space<vmem>>, %arg2: memref<32x256xbf16, #tpu.memory_space<vmem>>, %arg3: memref<1x256xf32, #tpu.memory_space<vmem>>, %arg4: memref<16x256xf32, #tpu.memory_space<vmem>>) attributes {dimension_semantics = [#tpu.dimension_semantics<parallel>], iteration_bounds = array<i64: 1>, scalar_prefetch = 0 : i64, scratch_operands = 0 : i64, tpu.core_type = #tpu.core_type<tc>, window_params = [{transform_indices = @transform_0, window_bounds = array<i64: 16, 32>}, {pipeline_mode = #tpu.pipeline_mode<synchronous>, transform_indices = @transform_1, window_bounds = array<i64: 32, 256>}, {pipeline_mode = #tpu.pipeline_mode<synchronous>, transform_indices = @transform_2, window_bounds = array<i64: 1, 256>}, {transform_indices = @transform_3, window_bounds = array<i64: 16, 256>}]} {
    %c0 = arith.constant 0 : index
    %c0_0 = arith.constant 0 : index
    %0 = vector.load %arg1[%c0, %c0_0] : memref<16x32xbf16, #tpu.memory_space<vmem>>, vector<16x32xbf16>
    %c0_1 = arith.constant 0 : index
    %c0_2 = arith.constant 0 : index
    %1 = vector.load %arg2[%c0_1, %c0_2] : memref<32x256xbf16, #tpu.memory_space<vmem>>, vector<32x256xbf16>
    %cst = arith.constant dense<0.000000e+00> : vector<16x256xf32>
    %2 = tpu.matmul %0, %1, %cst {dimension_numbers = #tpu.dot_dimension_numbers<[1], [0], [0], [1], [0, 0, 1, 1], [], []>} : vector<16x32xbf16>, vector<32x256xbf16>, vector<16x256xf32> -> vector<16x256xf32>
    %c0_3 = arith.constant 0 : index
    %c0_4 = arith.constant 0 : index
    %3 = vector.load %arg3[%c0_3, %c0_4] : memref<1x256xf32, #tpu.memory_space<vmem>>, vector<1x256xf32>
    %4 = vector.broadcast %3 : vector<1x256xf32> to vector<16x256xf32>
    %5 = arith.addf %2, %4 : vector<16x256xf32>
    %cst_5 = arith.constant dense<0xFF800000> : vector<16xf32>
    %6 = vector.multi_reduction <maximumf>, %5, %cst_5 [1] : vector<16x256xf32> to vector<16xf32>
    %7 = vector.shape_cast %6 : vector<16xf32> to vector<16x1xf32>
    %8 = vector.broadcast %7 : vector<16x1xf32> to vector<16x256xf32>
    %9 = arith.subf %5, %8 : vector<16x256xf32>
    %10 = math.exp %9 : vector<16x256xf32>
    %cst_6 = arith.constant dense<0.000000e+00> : vector<16xf32>
    %11 = vector.multi_reduction <add>, %10, %cst_6 [1] : vector<16x256xf32> to vector<16xf32>
    %12 = vector.shape_cast %11 : vector<16xf32> to vector<16x1xf32>
    %13 = math.log %12 : vector<16x1xf32>
    %14 = vector.broadcast %13 : vector<16x1xf32> to vector<16x256xf32>
    %15 = arith.subf %9, %14 : vector<16x256xf32>
    %c0_7 = arith.constant 0 : index
    %c0_8 = arith.constant 0 : index
    %16 = vector.load %arg4[%c0_7, %c0_8] : memref<16x256xf32, #tpu.memory_space<vmem>>, vector<16x256xf32>
    tpu.vector_store %arg4[%c0_7, %c0_8], %15 {strides = array<i32>} : memref<16x256xf32, #tpu.memory_space<vmem>>, vector<16x256xf32>,
    return
  }
  func.func @transform_0(%arg0: i32) -> (i32, i32) {
    %c0_i32 = arith.constant 0 : i32
    %c0_i32_0 = arith.constant 0 : i32
    return %arg0, %c0_i32 : i32, i32
  }
  func.func @transform_1(%arg0: i32) -> (i32, i32) {
    %c0_i32 = arith.constant 0 : i32
    %c0_i32_0 = arith.constant 0 : i32
    %c0_i32_1 = arith.constant 0 : i32
    return %c0_i32, %c0_i32_0 : i32, i32
  }
  func.func @transform_2(%arg0: i32) -> (i32, i32) {
    %c0_i32 = arith.constant 0 : i32
    %c0_i32_0 = arith.constant 0 : i32
    %c0_i32_1 = arith.constant 0 : i32
    return %c0_i32, %c0_i32_0 : i32, i32
  }
  func.func @transform_3(%arg0: i32) -> (i32, i32) {
    %c0_i32 = arith.constant 0 : i32
    %c0_i32_0 = arith.constant 0 : i32
    return %arg0, %c0_i32 : i32, i32
  }
}

</mosaic_0001>

<bundles_post_ra>
// kernel: tpu_custom_call.1
= control target key start
LH: loop header
LB: loop body
LE: loop exit
PB: predicated region body
PF: predicated region fallthrough
CT: control target
= control target key end

     0   :  { %8 = vsyncpa [#allocation3], 0  ;;  %s379_s0 = inlined_call_operand.hbm [shape: bf16[16,32], index: 0, kind: input, shape index: {}]   ;;  %s380_s1 = inlined_call_operand.hbm [shape: bf16[32,256], index: 1, kind: input, shape index: {}]   ;;  %s381_s2 = inlined_call_operand.hbm [shape: f32[1,256], index: 2, kind: input, shape index: {}]   ;;  %s382_s3 = inlined_call_operand.hbm [shape: f32[16,256], index: 3, kind: output, shape index: {}]  }
   0x1   :  { %9 = vsyncpa [#allocation6], 0  ;;  %s28_s14 = sshll.u32 %s380_s1, 4  ;;  %s29_s14 = int_to_ptr.hbm [resolvable:$true] %s28_s14 }
   0x2   :  { %10 = vsyncpa [#allocation4], 0  ;;  %s337_s15 = smov [#allocation5]   ;;  %s15_s19 = sshll.u32 %s379_s0, 4  ;;  %s16_s19 = int_to_ptr.hbm [resolvable:$true] %s15_s19 }
   0x3   :  { %s30_s16 = sshll.u32 %s337_s15, 4  ;;  %s338_s20 = smov 128   ;;  %s31_s16 = int_to_ptr.vmem [resolvable:$true] %s30_s16 }
   0x4   :  { %s339_s21 = smov 8   ;;  %s340_s22 = smov [#allocation2]  }
   0x5   :  { %36 = dma.hbm_to_vmem [thread:$0]  %s29_s14, 512, %s31_s16, [#allocation6], %s338_s20, %s338_s20, %s339_s21  }
   0x6   :  { %s17_s23 = sshll.u32 %s340_s22, 4  ;;  %s341_s24 = smov 64   ;;  %s18_s23 = int_to_ptr.vmem [resolvable:$true] %s17_s23 }
   0x7   :  { %s342_s25 = smov 4   ;;  %s42_s27 = sshll.u32 %s381_s2, 4  ;;  %s43_s27 = int_to_ptr.hbm [resolvable:$true] %s42_s27 }
   0x8   :  { %23 = dma.hbm_to_vmem [thread:$0]  %s16_s19, 128, %s18_s23, [#allocation3], %s341_s24, %s341_s24, %s342_s25  }
   0x9   :  { %s343_s28 = smov [#allocation7]  }
   0xa   :  { %s44_s29 = sshll.u32 %s343_s28, 4  ;;  %s45_s29 = int_to_ptr.vmem [resolvable:$true] %s44_s29 }
   0xb   :  { %47 = dma.hbm_to_vmem [thread:$0]  %s43_s27, 32, %s45_s29, [#allocation6]  }
   0xc   :  { %331 = dma.done.wait [#allocation3], 128  }
   0xd   :  { %332 = vsyncadd [#allocation3], 4294967168 }
   0xe   :  { %333 = dma.done.wait [#allocation6], 544  }
   0xf   :  { %334 = vsyncadd [#allocation6], 4294966752  ;;  %v200_v0 = vld [vmem:[#allocation5 + $0x10] sm:$0xf]  ;;  %v212_v1 = vld [vmem:[#allocation5 + $0x14] sm:$0xf0] }
  0x10   :  { %v211_v2 = vld [vmem:[#allocation5 + $0x14] sm:$0xf]  ;;  %v201_v3 = vor.u32 %v212_v1, %v200_v0  ;;  %v202_v4 = vld [vmem:[#allocation5 + $0x18] sm:$0xf0]  ;;  %v192_v5 = vld [vmem:[#allocation5] sm:$0xf] }
  0x11   :  { %v210_v6 = vld [vmem:[#allocation5 + $0x4] sm:$0xf0]  ;;  %v205_v7 = vor.u32 %v211_v2, %v202_v4  ;;  %v209_v8 = vld [vmem:[#allocation5 + $0x4] sm:$0xf]  ;;  %v194_v9 = vld [vmem:[#allocation5 + $0x8] sm:$0xf0] }
  0x12   :  { %108 = vmatpush.bf16.msra.mxu0 %v201_v3  ;;  %v193_v10 = vor.u32 %v210_v6, %v192_v5  ;;  %v197_v11 = vor.u32 %v209_v8, %v194_v9  ;;  %v208_v12 = vld [vmem:[#allocation2] sm:$0xff]  ;;  %vm98_vm0 = vcmask 261120   ;;  %v67_v13 = vld [vmem:[#allocation7] sm:$0x3]  ;;  %s344_s0 = smov [#allocation8]   ;;  %s172_s5 = sshll.u32 %s382_s3, 4  ;;  %s173_s5 = int_to_ptr.hbm [resolvable:$true] %s172_s5 }
  0x13   :  { %122 = vmatpush.bf16.msra.mxu1 %v205_v7  ;;  %v69_v14 = vperm.slane %v67_v13, 0  ;;  %v70_v15 = vperm.slane %v67_v13, 1  ;;  %s170_s2 = sshll.u32 %s344_s0, 4  ;;  %s345_s6 = smov 256   ;;  %s171_s2 = int_to_ptr.vmem [resolvable:$true] %s170_s2 }
  0x14   :  { %s346_s7 = smov 16  }
  0x16   :  { %109 = vmatpush.bf16.msra.mxu0 %v193_v10 }
  0x17   :  { %123 = vmatpush.bf16.msra.mxu1 %v197_v11 }
  0x19   :  { %206 = vmatmul.msk.bf16.vlgmr.msra.gmra.mxu0 %vm98_vm0, %v208_v12 }
  0x1a   :  { %207 = vmatmul.msk.bf16.vlgmr.msra.gmra.mxu1 %vm98_vm0, %v208_v12 }
  0x96   :  { %v111_v16 = vpop.f32.mrf.mxu0 }
  0x97   :  { %v112_v17 = vadd.f32 %v111_v16, %v69_v14  ;;  %v125_v18 = vpop.f32.mrf.mxu1 }
  0x98   :  { %v126_v19 = vadd.f32 %v125_v18, %v70_v15 }
  0x9a   :  { %v130_v20 = vmax.f32 %v112_v17, %v126_v19 }
  0x9c   :  { %131 = vmax.xlane.f32.xlu0 %v130_v20 }
  0x9e   :  { %v113_v21 = vpop.f32.mrf.mxu0 }
  0x9f   :  { %v114_v22 = vadd.f32 %v113_v21, %v69_v14  ;;  %v127_v23 = vpop.f32.mrf.mxu1 }
  0xa0   :  { %v128_v24 = vadd.f32 %v127_v23, %v70_v15 }
  0xa2   :  { %v133_v25 = vmax.f32 %v114_v22, %v128_v24 }
  0xa4   :  { %134 = vmax.xlane.f32.xlu0 %v133_v25 }
 0x10f   :  { %v132_v26 = vpop.xlane.xlu0 %131 }
 0x110   :  { %v136_v27 = vsub.f32 %v112_v17, %v132_v26  ;;  %v137_v28 = vsub.f32 %v126_v19, %v132_v26 }
 0x112   :  { %v140_v29 = vmul.f32 1.442695, %v136_v27  ;;  %v142_v30 = vmul.f32 1.442695, %v137_v28 }
 0x114   :  { %223 = vpow2.f32 %v140_v29 }
 0x115   :  { %225 = vpow2.f32 %v142_v30 }
 0x117   :  { %v135_v31 = vpop.xlane.xlu0 %134 }
 0x118   :  { %v138_v32 = vsub.f32 %v114_v22, %v135_v31  ;;  %v139_v33 = vsub.f32 %v128_v24, %v135_v31 }
 0x11a   :  { %v224_v34 = vpop.eup %223  ;;  %v144_v35 = vmul.f32 1.442695, %v138_v32  ;;  %v146_v36 = vmul.f32 1.442695, %v139_v33 }
 0x11b   :  { %v226_v37 = vpop.eup %225 }
 0x11c   :  { %227 = vpow2.f32 %v144_v35  ;;  %v148_v38 = vadd.f32 %v226_v37, %v224_v34 }
 0x11d   :  { %229 = vpow2.f32 %v146_v36 }
 0x11e   :  { %149 = vadd.xlane.f32.xlu1 %v148_v38 }
 0x122   :  { %v228_v39 = vpop.eup %227 }
 0x123   :  { %v230_v40 = vpop.eup %229 }
 0x124   :  { %v151_v41 = vadd.f32 %v230_v40, %v228_v39 }
 0x126   :  { %152 = vadd.xlane.f32.xlu1 %v151_v41 }
 0x191   :  { %v150_v42 = vpop.xlane.xlu1 %149 }
 0x192   :  { %231 = vlog2.f32 %v150_v42 }
 0x198   :  { %v232_v43 = vpop.eup %231 }
 0x199   :  { %v155_v44 = vmul.f32 0.6931472, %v232_v43  ;;  %v153_v45 = vpop.xlane.xlu1 %152 }
 0x19a   :  { %233 = vlog2.f32 %v153_v45 }
 0x19b   :  { %v158_v46 = vsub.f32 %v136_v27, %v155_v44  ;;  %v159_v47 = vsub.f32 %v137_v28, %v155_v44 }
 0x19d   :  { %162 = vst [vmem:[#allocation8] sm:$0xff] %v158_v46 }
 0x19e   :  { %163 = vst [vmem:[#allocation8 + $0x8] sm:$0xff] %v159_v47 }
 0x1a0   :  { %v234_v48 = vpop.eup %233 }
 0x1a1   :  { %v157_v49 = vmul.f32 0.6931472, %v234_v48 }
 0x1a3   :  { %v160_v50 = vsub.f32 %v138_v32, %v157_v49  ;;  %v161_v51 = vsub.f32 %v139_v33, %v157_v49 }
 0x1a5   :  { %164 = vst [vmem:[#allocation8 + $0x10] sm:$0xff] %v160_v50 }
 0x1a6   :  { %165 = vst [vmem:[#allocation8 + $0x18] sm:$0xff] %v161_v51 }
 0x1a7   :  { %178 = dma.vmem_to_hbm [thread:$0]  %s171_s2, 512, %s173_s5, [#allocation4], %s345_s6, %s345_s6, %s346_s7  }
 0x1a8   :  { %335 = dma.done.wait [#allocation4], 512  }
 0x1a9   :  { %336 = vsyncadd [#allocation4], 4294966784 }
 0x1aa   :  { %183 = vsyncpa [#allocation3], 1 }
 0x1ab   :  { %184 = vsyncpa [#allocation6], 1 }
 0x1ac   :  { %185 = vsyncpa [#allocation4], 1 }

// kernel: tpu_custom_call.1
= control target key start
LH: loop header
LB: loop body
LE: loop exit
PB: predicated region body
PF: predicated region fallthrough
CT: control target
= control target key end

     0   :  { %8 = vsyncpa [#allocation3], 0  ;;  %s379_s0 = inlined_call_operand.hbm [shape: bf16[16,32], index: 0, kind: input, shape index: {}]   ;;  %s380_s1 = inlined_call_operand.hbm [shape: bf16[32,256], index: 1, kind: input, shape index: {}]   ;;  %s381_s2 = inlined_call_operand.hbm [shape: f32[1,256], index: 2, kind: input, shape index: {}]   ;;  %s382_s3 = inlined_call_operand.hbm [shape: f32[16,256], index: 3, kind: output, shape index: {}]  }
   0x1   :  { %9 = vsyncpa [#allocation6], 0  ;;  %s28_s14 = sshll.u32 %s380_s1, 4  ;;  %s29_s14 = int_to_ptr.hbm [resolvable:$true] %s28_s14 }
   0x2   :  { %10 = vsyncpa [#allocation4], 0  ;;  %s337_s15 = smov [#allocation5]   ;;  %s15_s19 = sshll.u32 %s379_s0, 4  ;;  %s16_s19 = int_to_ptr.hbm [resolvable:$true] %s15_s19 }
   0x3   :  { %s30_s16 = sshll.u32 %s337_s15, 4  ;;  %s338_s20 = smov 128   ;;  %s31_s16 = int_to_ptr.vmem [resolvable:$true] %s30_s16 }
   0x4   :  { %s339_s21 = smov 8   ;;  %s340_s22 = smov [#allocation2]  }
   0x5   :  { %36 = dma.hbm_to_vmem [thread:$0]  %s29_s14, 512, %s31_s16, [#allocation6], %s338_s20, %s338_s20, %s339_s21  }
   0x6   :  { %s17_s23 = sshll.u32 %s340_s22, 4  ;;  %s341_s24 = smov 64   ;;  %s18_s23 = int_to_ptr.vmem [resolvable:$true] %s17_s23 }
   0x7   :  { %s342_s25 = smov 4   ;;  %s42_s27 = sshll.u32 %s381_s2, 4  ;;  %s43_s27 = int_to_ptr.hbm [resolvable:$true] %s42_s27 }
   0x8   :  { %23 = dma.hbm_to_vmem [thread:$0]  %s16_s19, 128, %s18_s23, [#allocation3], %s341_s24, %s341_s24, %s342_s25  }
   0x9   :  { %s343_s28 = smov [#allocation7]  }
   0xa   :  { %s44_s29 = sshll.u32 %s343_s28, 4  ;;  %s45_s29 = int_to_ptr.vmem [resolvable:$true] %s44_s29 }
   0xb   :  { %47 = dma.hbm_to_vmem [thread:$0]  %s43_s27, 32, %s45_s29, [#allocation6]  }
   0xc   :  { %331 = dma.done.wait [#allocation3], 128  }
   0xd   :  { %332 = vsyncadd [#allocation3], 4294967168 }
   0xe   :  { %333 = dma.done.wait [#allocation6], 544  }
   0xf   :  { %334 = vsyncadd [#allocation6], 4294966752  ;;  %v200_v0 = vld [vmem:[#allocation5 + $0x10] sm:$0xf]  ;;  %v212_v1 = vld [vmem:[#allocation5 + $0x14] sm:$0xf0] }
  0x10   :  { %v211_v2 = vld [vmem:[#allocation5 + $0x14] sm:$0xf]  ;;  %v201_v3 = vor.u32 %v212_v1, %v200_v0  ;;  %v202_v4 = vld [vmem:[#allocation5 + $0x18] sm:$0xf0]  ;;  %v192_v5 = vld [vmem:[#allocation5] sm:$0xf] }
  0x11   :  { %v210_v6 = vld [vmem:[#allocation5 + $0x4] sm:$0xf0]  ;;  %v205_v7 = vor.u32 %v211_v2, %v202_v4  ;;  %v209_v8 = vld [vmem:[#allocation5 + $0x4] sm:$0xf]  ;;  %v194_v9 = vld [vmem:[#allocation5 + $0x8] sm:$0xf0] }
  0x12   :  { %108 = vmatpush.bf16.msra.mxu0 %v201_v3  ;;  %v193_v10 = vor.u32 %v210_v6, %v192_v5  ;;  %v197_v11 = vor.u32 %v209_v8, %v194_v9  ;;  %v208_v12 = vld [vmem:[#allocation2] sm:$0xff]  ;;  %vm98_vm0 = vcmask 261120   ;;  %v67_v13 = vld [vmem:[#allocation7] sm:$0x3]  ;;  %s344_s0 = smov [#allocation8]   ;;  %s172_s5 = sshll.u32 %s382_s3, 4  ;;  %s173_s5 = int_to_ptr.hbm [resolvable:$true] %s172_s5 }
  0x13   :  { %122 = vmatpush.bf16.msra.mxu1 %v205_v7  ;;  %v69_v14 = vperm.slane %v67_v13, 0  ;;  %v70_v15 = vperm.slane %v67_v13, 1  ;;  %s170_s2 = sshll.u32 %s344_s0, 4  ;;  %s345_s6 = smov 256   ;;  %s171_s2 = int_to_ptr.vmem [resolvable:$true] %s170_s2 }
  0x14   :  { %s346_s7 = smov 16  }
  0x16   :  { %109 = vmatpush.bf16.msra.mxu0 %v193_v10 }
  0x17   :  { %123 = vmatpush.bf16.msra.mxu1 %v197_v11 }
  0x19   :  { %206 = vmatmul.msk.bf16.vlgmr.msra.gmra.mxu0 %vm98_vm0, %v208_v12 }
  0x1a   :  { %207 = vmatmul.msk.bf16.vlgmr.msra.gmra.mxu1 %vm98_vm0, %v208_v12 }
  0x96   :  { %v111_v16 = vpop.f32.mrf.mxu0 }
  0x97   :  { %v112_v17 = vadd.f32 %v111_v16, %v69_v14  ;;  %v125_v18 = vpop.f32.mrf.mxu1 }
  0x98   :  { %v126_v19 = vadd.f32 %v125_v18, %v70_v15 }
  0x9a   :  { %v130_v20 = vmax.f32 %v112_v17, %v126_v19 }
  0x9c   :  { %131 = vmax.xlane.f32.xlu0 %v130_v20 }
  0x9e   :  { %v113_v21 = vpop.f32.mrf.mxu0 }
  0x9f   :  { %v114_v22 = vadd.f32 %v113_v21, %v69_v14  ;;  %v127_v23 = vpop.f32.mrf.mxu1 }
  0xa0   :  { %v128_v24 = vadd.f32 %v127_v23, %v70_v15 }
  0xa2   :  { %v133_v25 = vmax.f32 %v114_v22, %v128_v24 }
  0xa4   :  { %134 = vmax.xlane.f32.xlu0 %v133_v25 }
 0x10f   :  { %v132_v26 = vpop.xlane.xlu0 %131 }
 0x110   :  { %v136_v27 = vsub.f32 %v112_v17, %v132_v26  ;;  %v137_v28 = vsub.f32 %v126_v19, %v132_v26 }
 0x112   :  { %v140_v29 = vmul.f32 1.442695, %v136_v27  ;;  %v142_v30 = vmul.f32 1.442695, %v137_v28 }
 0x114   :  { %223 = vpow2.f32 %v140_v29 }
 0x115   :  { %225 = vpow2.f32 %v142_v30 }
 0x117   :  { %v135_v31 = vpop.xlane.xlu0 %134 }
 0x118   :  { %v138_v32 = vsub.f32 %v114_v22, %v135_v31  ;;  %v139_v33 = vsub.f32 %v128_v24, %v135_v31 }
 0x11a   :  { %v224_v34 = vpop.eup %223  ;;  %v144_v35 = vmul.f32 1.442695, %v138_v32  ;;  %v146_v36 = vmul.f32 1.442695, %v139_v33 }
 0x11b   :  { %v226_v37 = vpop.eup %225 }
 0x11c   :  { %227 = vpow2.f32 %v144_v35  ;;  %v148_v38 = vadd.f32 %v226_v37, %v224_v34 }
 0x11d   :  { %229 = vpow2.f32 %v146_v36 }
 0x11e   :  { %149 = vadd.xlane.f32.xlu1 %v148_v38 }
 0x122   :  { %v228_v39 = vpop.eup %227 }
 0x123   :  { %v230_v40 = vpop.eup %229 }
 0x124   :  { %v151_v41 = vadd.f32 %v230_v40, %v228_v39 }
 0x126   :  { %152 = vadd.xlane.f32.xlu1 %v151_v41 }
 0x191   :  { %v150_v42 = vpop.xlane.xlu1 %149 }
 0x192   :  { %231 = vlog2.f32 %v150_v42 }
 0x198   :  { %v232_v43 = vpop.eup %231 }
 0x199   :  { %v155_v44 = vmul.f32 0.6931472, %v232_v43  ;;  %v153_v45 = vpop.xlane.xlu1 %152 }
 0x19a   :  { %233 = vlog2.f32 %v153_v45 }
 0x19b   :  { %v158_v46 = vsub.f32 %v136_v27, %v155_v44  ;;  %v159_v47 = vsub.f32 %v137_v28, %v155_v44 }
 0x19d   :  { %162 = vst [vmem:[#allocation8] sm:$0xff] %v158_v46 }
 0x19e   :  { %163 = vst [vmem:[#allocation8 + $0x8] sm:$0xff] %v159_v47 }
 0x1a0   :  { %v234_v48 = vpop.eup %233 }
 0x1a1   :  { %v157_v49 = vmul.f32 0.6931472, %v234_v48 }
 0x1a3   :  { %v160_v50 = vsub.f32 %v138_v32, %v157_v49  ;;  %v161_v51 = vsub.f32 %v139_v33, %v157_v49 }
 0x1a5   :  { %164 = vst [vmem:[#allocation8 + $0x10] sm:$0xff] %v160_v50 }
 0x1a6   :  { %165 = vst [vmem:[#allocation8 + $0x18] sm:$0xff] %v161_v51 }
 0x1a7   :  { %178 = dma.vmem_to_hbm [thread:$0]  %s171_s2, 512, %s173_s5, [#allocation4], %s345_s6, %s345_s6, %s346_s7  }
 0x1a8   :  { %335 = dma.done.wait [#allocation4], 512  }
 0x1a9   :  { %336 = vsyncadd [#allocation4], 4294966784 }
 0x1aa   :  { %183 = vsyncpa [#allocation3], 1 }
 0x1ab   :  { %184 = vsyncpa [#allocation6], 1 }
 0x1ac   :  { %185 = vsyncpa [#allocation4], 1 }

</bundles_post_ra>
